<compile_context>
chip_gen: v7x
topology: tpu7x:2x2x1
jax: 0.10.0
libtpu: 0.0.40
codegen_flags: <defaults>
</compile_context>

<pallas_src>
import jax
import jax.numpy as jnp
from jax.experimental import pallas as pl
from jax.experimental.pallas import tpu as pltpu

EPS = 1e-5

_TARGET_PIXELS = 16384   # Nb*HWt per grid step: ~640 KB HBM traffic at bf16
_NB_MAX = 32             # cap kron(I_Nb, W) zero-fill so MXU never binds on v5e


def _cspx0_kernel(x_ref, w1_ref, b1_ref, w2_ref, b2_ref, out_ref):
    x = x_ref[...]                                                    # (Nb*Cin, HWt)
    # stage 1: folded conv+BN (block-diagonal over the Nb samples), ReLU
    h = jnp.dot(w1_ref[...], x, preferred_element_type=jnp.float32)
    h = jnp.maximum(h + b1_ref[...], 0.0)                             # (Nb*C0, HWt) f32
    # stage 2: fused [bypass ; l] folded conv+BN (res_blocks empty), ReLU
    h = h.astype(w2_ref.dtype)
    y = jnp.dot(w2_ref[...], h, preferred_element_type=jnp.float32)
    y = jnp.maximum(y + b2_ref[...], 0.0)                             # (Nb*Cout, HWt)
    out_ref[...] = y.astype(out_ref.dtype)


def _fold_conv_bn(w, b, gamma, beta, mean, var):
    """Fold eval-mode BatchNorm2d into a 1x1 conv -> (Cout, Cin) weight, (Cout,1) bias."""
    cout, cin = w.shape[0], w.shape[1]
    scale = gamma / jnp.sqrt(var + EPS)                       # (Cout,)
    w_t = w.reshape(cout, cin) * scale[:, None]               # (Cout, Cin)
    b_fold = b * scale + (beta - mean * scale)                # (Cout,)
    return w_t.astype(jnp.float32), b_fold.reshape(cout, 1).astype(jnp.float32)


def _choose_tiling(n, cin, cout, hw):
    """Pick (Nb samples per block, HWt lanes per block).

    Legality ((8,128) rule): Nb*Cin and Nb*Cout multiples of 8 unless Nb == N
    (full-dim block); HWt multiple of 128 unless HWt == HW.
    Targets ~_TARGET_PIXELS pixels/step (amortizes the ~0.35us per-step cost;
    ~2.6 MB double-buffered VMEM -> fits v5e 16 MiB scoped and v7x 32 MiB
    scoped / 64 MiB physical), and keeps >= 2 grid steps when possible so both
    v7x TensorCores get work.
    """
    # lane (HW) tile
    if hw % 128 != 0 or hw <= _TARGET_PIXELS:
        hwt = hw                      # full-dim block is always legal
    else:
        best, q = 128, 1
        while q * 128 <= _TARGET_PIXELS:
            if (hw // 128) % q == 0:
                best = q * 128
            q += 1
        hwt = best
    # batch (sublane) tile: largest divisor of n within the limits
    nb_limit = max(1, min(_NB_MAX, _TARGET_PIXELS // hwt, n))
    nb = None
    for c in range(1, n + 1):
        if n % c != 0 or c > nb_limit:
            continue
        if (c == n) or ((c * cin) % 8 == 0 and (c * cout) % 8 == 0):
            nb = c
    if nb is None:
        nb = n                        # full-dim fallback, always legal
    # keep >= 2 grid steps when the problem allows it (v7x has 2 TensorCores)
    if (n // nb) * (hw // hwt) < 2:
        if hwt % 256 == 0:
            hwt //= 2
        elif nb % 2 == 0 and ((nb // 2) * cin) % 8 == 0 and ((nb // 2) * cout) % 8 == 0:
            nb //= 2
    return nb, hwt


def cspx0_forward(x_nchw, params, *, compute_dtype=jnp.bfloat16, out_dtype=None):
    if out_dtype is None:
        out_dtype = compute_dtype
    n, cin, h, w = x_nchw.shape
    hw = h * w

    w1, b1 = _fold_conv_bn(*params["f"])        # (C0, Cin), (C0, 1)
    wb, bb = _fold_conv_bn(*params["bypass"])   # (Cb, C0), (Cb, 1)
    wl, bl = _fold_conv_bn(*params["l"])        # (Cl, C0), (Cl, 1)
    c0 = w1.shape[0]
    assert w1.shape[1] == cin and wb.shape[1] == c0 and wl.shape[1] == c0

    # Fuse bypass + l (order matches torch.cat((bypass_out, l_out), dim=1)).
    w2 = jnp.concatenate([wb, wl], axis=0)      # (Cout, C0)
    b2 = jnp.concatenate([bb, bl], axis=0)      # (Cout, 1)
    cout = w2.shape[0]

    nb, hwt = _choose_tiling(n, cin, cout, hw)
    grid = (n // nb, hw // hwt)

    # Block-diagonal weights: one dense matmul handles all Nb samples of a block.
    w1_bd = jnp.kron(jnp.eye(nb, dtype=jnp.float32), w1).astype(compute_dtype)
    w2_bd = jnp.kron(jnp.eye(nb, dtype=jnp.float32), w2).astype(compute_dtype)
    b1_bd = jnp.tile(b1, (nb, 1))               # (Nb*C0, 1)  f32
    b2_bd = jnp.tile(b2, (nb, 1))               # (Nb*Cout,1) f32

    # NCHW -> (N*Cin, H*W): pure reshape (contiguous).  bf16 cast (default) —
    # no fp32 upcast; if x already arrives in compute_dtype this is a no-op.
    x2d = x_nchw.reshape(n * cin, hw).astype(compute_dtype)

    in_b = jnp.dtype(compute_dtype).itemsize
    out_b = jnp.dtype(out_dtype).itemsize
    cost = pl.CostEstimate(
        flops=2 * n * hw * (cin * c0 + c0 * cout),
        transcendentals=0,
        bytes_accessed=n * hw * (cin * in_b + cout * out_b)
        + (w1_bd.size + w2_bd.size) * in_b + (b1_bd.size + b2_bd.size) * 4,
    )

    out2d = pl.pallas_call(
        _cspx0_kernel,
        out_shape=jax.ShapeDtypeStruct((n * cout, hw), out_dtype),
        grid_spec=pltpu.PrefetchScalarGridSpec(
            num_scalar_prefetch=0,
            grid=grid,
            in_specs=[
                pl.BlockSpec((nb * cin, hwt), lambda i, j: (i, j)),    # Nb samples
                pl.BlockSpec((nb * c0, nb * cin), lambda i, j: (0, 0)),
                pl.BlockSpec((nb * c0, 1), lambda i, j: (0, 0)),
                pl.BlockSpec((nb * cout, nb * c0), lambda i, j: (0, 0)),
                pl.BlockSpec((nb * cout, 1), lambda i, j: (0, 0)),
            ],
            out_specs=pl.BlockSpec((nb * cout, hwt), lambda i, j: (i, j)),
        ),
        compiler_params=pltpu.CompilerParams(
            dimension_semantics=("parallel", "parallel"),
        ),
        cost_estimate=cost,
    )(x2d, w1_bd, b1_bd, w2_bd, b2_bd)

    # (N*Cout, H*W) -> NCHW: pure reshape (rows are grouped per sample).
    return out2d.reshape(n, cout, h, w)


# ------------------------- reference / test harness -------------------------

def _init_cba_params(key, cin, cout):
    ks = jax.random.split(key, 6)
    w = jax.random.normal(ks[0], (cout, cin, 1, 1), jnp.float32) * 0.2
    b = jax.random.normal(ks[1], (cout,), jnp.float32) * 0.1
    gamma = 1.0 + 0.1 * jax.random.normal(ks[2], (cout,), jnp.float32)
    beta = 0.1 * jax.random.normal(ks[3], (cout,), jnp.float32)
    mean = 0.1 * jax.random.normal(ks[4], (cout,), jnp.float32)
    var = jnp.abs(jax.random.normal(ks[5], (cout,), jnp.float32)) + 0.5
    return (w, b, gamma, beta, mean, var)


def _ref_cba(x_nchw, w, b, gamma, beta, mean, var):
    cout, cin = w.shape[0], w.shape[1]
    y = jnp.einsum("nchw,oc->nohw", x_nchw, w.reshape(cout, cin)) + b[None, :, None, None]
    y = (y - mean[None, :, None, None]) / jnp.sqrt(var[None, :, None, None] + EPS)
    y = y * gamma[None, :, None, None] + beta[None, :, None, None]
    return jnp.maximum(y, 0.0)


def cspx0_reference(x_nchw, params):
    h = _ref_cba(x_nchw, *params["f"])
    byp = _ref_cba(h, *params["bypass"])
    lst = _ref_cba(h, *params["l"])
    return jnp.concatenate([byp, lst], axis=1)


if __name__ == "__main__":
    key = jax.random.PRNGKey(0)
    k_x, k_f, k_b, k_l = jax.random.split(key, 4)

    N, C_IN, H, W = 2, 4, 16, 16
    OUT_CHANNELS = [4, 8, 8]   # [f, l, bypass]; f must equal C_IN for shape consistency

    x = jax.random.normal(k_x, (N, C_IN, H, W), jnp.float32)

    params = {
        "f": _init_cba_params(k_f, C_IN, OUT_CHANNELS[0]),
        "bypass": _init_cba_params(k_b, C_IN, OUT_CHANNELS[-1]),
        "l": _init_cba_params(k_l, OUT_CHANNELS[0], OUT_CHANNELS[-2]),
    }

    ref = jax.block_until_ready(cspx0_reference(x, params))
    COUT = OUT_CHANNELS[-1] + OUT_CHANNELS[-2]

    # 1) fp32 path: exact algebra check against the pure-JAX reference.
    out_f32 = jax.block_until_ready(
        cspx0_forward(x, params, compute_dtype=jnp.float32))
    assert out_f32.shape == (N, COUT, H, W), out_f32.shape
    assert jnp.allclose(out_f32, ref, atol=1e-4, rtol=1e-4), \
        float(jnp.max(jnp.abs(out_f32 - ref)))

    # 2) default bf16 path (the HBM-optimized one): bf16-appropriate tolerance.
    out_bf16 = jax.block_until_ready(cspx0_forward(x, params))
    assert out_bf16.shape == (N, COUT, H, W), out_bf16.shape
    assert out_bf16.dtype == jnp.bfloat16, out_bf16.dtype
    assert jnp.allclose(out_bf16.astype(jnp.float32), ref, atol=1e-1, rtol=1e-1), \
        float(jnp.max(jnp.abs(out_bf16.astype(jnp.float32) - ref)))

    print("KERNEL_OK")
</pallas_src>

<mosaic_0001>
module attributes {stable_mosaic.version = 11 : i64} {
  func.func @_cspx0_kernel(%arg0: i32, %arg1: i32, %arg2: memref<8x128xf32, #tpu.memory_space<vmem>>, %arg3: memref<8x8xf32, #tpu.memory_space<vmem>>, %arg4: memref<8x1xf32, #tpu.memory_space<vmem>>, %arg5: memref<32x8xf32, #tpu.memory_space<vmem>>, %arg6: memref<32x1xf32, #tpu.memory_space<vmem>>, %arg7: memref<32x128xf32, #tpu.memory_space<vmem>>) attributes {dimension_semantics = [#tpu.dimension_semantics<parallel>, #tpu.dimension_semantics<parallel>], iteration_bounds = array<i64: 1, 2>, scalar_prefetch = 0 : i64, scratch_operands = 0 : i64, tpu.core_type = #tpu.core_type<tc>, window_params = [{transform_indices = @transform_0, window_bounds = array<i64: 8, 128>}, {pipeline_mode = #tpu.pipeline_mode<synchronous>, transform_indices = @transform_1, window_bounds = array<i64: 8, 8>}, {pipeline_mode = #tpu.pipeline_mode<synchronous>, transform_indices = @transform_2, window_bounds = array<i64: 8, 1>}, {pipeline_mode = #tpu.pipeline_mode<synchronous>, transform_indices = @transform_3, window_bounds = array<i64: 32, 8>}, {pipeline_mode = #tpu.pipeline_mode<synchronous>, transform_indices = @transform_4, window_bounds = array<i64: 32, 1>}, {transform_indices = @transform_5, window_bounds = array<i64: 32, 128>}]} {
    %c0 = arith.constant 0 : index
    %c0_0 = arith.constant 0 : index
    %0 = vector.load %arg2[%c0, %c0_0] : memref<8x128xf32, #tpu.memory_space<vmem>>, vector<8x128xf32>
    %c0_1 = arith.constant 0 : index
    %c0_2 = arith.constant 0 : index
    %1 = vector.load %arg3[%c0_1, %c0_2] : memref<8x8xf32, #tpu.memory_space<vmem>>, vector<8x8xf32>
    %cst = arith.constant dense<0.000000e+00> : vector<8x128xf32>
    %2 = tpu.matmul %1, %0, %cst {dimension_numbers = #tpu.dot_dimension_numbers<[1], [0], [0], [1], [0, 0, 1, 1], [], []>} : vector<8x8xf32>, vector<8x128xf32>, vector<8x128xf32> -> vector<8x128xf32>
    %c0_3 = arith.constant 0 : index
    %c0_4 = arith.constant 0 : index
    %3 = vector.load %arg4[%c0_3, %c0_4] : memref<8x1xf32, #tpu.memory_space<vmem>>, vector<8x1xf32>
    %4 = vector.broadcast %3 : vector<8x1xf32> to vector<8x128xf32>
    %5 = arith.addf %2, %4 : vector<8x128xf32>
    %cst_5 = arith.constant 0.000000e+00 : f32
    %6 = vector.broadcast %cst_5 : f32 to vector<8x128xf32>
    %7 = arith.maximumf %5, %6 : vector<8x128xf32>
    %c0_6 = arith.constant 0 : index
    %c0_7 = arith.constant 0 : index
    %8 = vector.load %arg5[%c0_6, %c0_7] : memref<32x8xf32, #tpu.memory_space<vmem>>, vector<32x8xf32>
    %cst_8 = arith.constant dense<0.000000e+00> : vector<32x128xf32>
    %9 = tpu.matmul %8, %7, %cst_8 {dimension_numbers = #tpu.dot_dimension_numbers<[1], [0], [0], [1], [0, 0, 1, 1], [], []>} : vector<32x8xf32>, vector<8x128xf32>, vector<32x128xf32> -> vector<32x128xf32>
    %c0_9 = arith.constant 0 : index
    %c0_10 = arith.constant 0 : index
    %10 = vector.load %arg6[%c0_9, %c0_10] : memref<32x1xf32, #tpu.memory_space<vmem>>, vector<32x1xf32>
    %11 = vector.broadcast %10 : vector<32x1xf32> to vector<32x128xf32>
    %12 = arith.addf %9, %11 : vector<32x128xf32>
    %cst_11 = arith.constant 0.000000e+00 : f32
    %13 = vector.broadcast %cst_11 : f32 to vector<32x128xf32>
    %14 = arith.maximumf %12, %13 : vector<32x128xf32>
    %c0_12 = arith.constant 0 : index
    %c0_13 = arith.constant 0 : index
    %15 = vector.load %arg7[%c0_12, %c0_13] : memref<32x128xf32, #tpu.memory_space<vmem>>, vector<32x128xf32>
    tpu.vector_store %arg7[%c0_12, %c0_13], %14 {strides = array<i32>} : memref<32x128xf32, #tpu.memory_space<vmem>>, vector<32x128xf32>,
    return
  }
  func.func @transform_0(%arg0: i32, %arg1: i32) -> (i32, i32) {
    %c0_i32 = arith.constant 0 : i32
    return %arg0, %arg1 : i32, i32
  }
  func.func @transform_1(%arg0: i32, %arg1: i32) -> (i32, i32) {
    %c0_i32 = arith.constant 0 : i32
    %c0_i32_0 = arith.constant 0 : i32
    %c0_i32_1 = arith.constant 0 : i32
    return %c0_i32, %c0_i32_0 : i32, i32
  }
  func.func @transform_2(%arg0: i32, %arg1: i32) -> (i32, i32) {
    %c0_i32 = arith.constant 0 : i32
    %c0_i32_0 = arith.constant 0 : i32
    %c0_i32_1 = arith.constant 0 : i32
    return %c0_i32, %c0_i32_0 : i32, i32
  }
  func.func @transform_3(%arg0: i32, %arg1: i32) -> (i32, i32) {
    %c0_i32 = arith.constant 0 : i32
    %c0_i32_0 = arith.constant 0 : i32
    %c0_i32_1 = arith.constant 0 : i32
    return %c0_i32, %c0_i32_0 : i32, i32
  }
  func.func @transform_4(%arg0: i32, %arg1: i32) -> (i32, i32) {
    %c0_i32 = arith.constant 0 : i32
    %c0_i32_0 = arith.constant 0 : i32
    %c0_i32_1 = arith.constant 0 : i32
    return %c0_i32, %c0_i32_0 : i32, i32
  }
  func.func @transform_5(%arg0: i32, %arg1: i32) -> (i32, i32) {
    %c0_i32 = arith.constant 0 : i32
    return %arg0, %arg1 : i32, i32
  }
}

</mosaic_0001>

<bundles_post_ra>
// kernel: tpu_custom_call.1
= control target key start
LH: loop header
LB: loop body
LE: loop exit
PB: predicated region body
PF: predicated region fallthrough
CT: control target
= control target key end

     0   :  { %10 = vsyncpa [#allocation3], 0  ;;  %s925_s0 = inlined_call_operand.vmem [shape: f32[8,256], index: 0, kind: input, shape index: {}]   ;;  %s926_s1 = inlined_call_operand.vmem [shape: f32[8,8], index: 1, kind: input, shape index: {}]   ;;  %s927_s2 = inlined_call_operand.vmem [shape: f32[8,1], index: 2, kind: input, shape index: {}]   ;;  %s928_s3 = inlined_call_operand.vmem [shape: f32[32,8], index: 3, kind: input, shape index: {}]   ;;  %s929_s4 = inlined_call_operand.vmem [shape: f32[32,1], index: 4, kind: input, shape index: {}]   ;;  %s930_s5 = inlined_call_operand.hbm [shape: f32[32,256], index: 5, kind: output, shape index: {}]  }
   0x1   :  { %12 = vsyncpa [#allocation3 + $0x1], 0  ;;  %s775_s18 = smov 0   ;;  %s777_s19 = smov 0  }
   0x2   :  { %s779_s20 = smov 0   ;;  %s781_s21 = smov 0  }
   0x3   :  { %s783_s22 = smov 0   ;;  %s785_s23 = smov 0  }
   0x4 LB: > { %s559_s24 = sadd.s32 4294967295, %s736_s23   ;;  %s560_s25 = sadd.s32 4294967294, %s736_s23   ;;  %s736_s23 = sphi %s785_s23, %s18_s23   ;;  %s732_s22 = sphi %s783_s22, %s937_s22   ;;  %s728_s21 = sphi %s781_s21, %s936_s21   ;;  %s724_s20 = sphi %s779_s20, %s935_s20   ;;  %s720_s19 = sphi %s777_s19, %s934_s19   ;;  %s716_s18 = sphi %s775_s18, %s933_s18  }
   0x5   : > { %s27_s26 = sadd.s32 1, %s732_s22  ;;  %s151_s27 = sadd.s32 1, %s724_s20 }
   0x6   : > { %p28_p0 = scmp.ge.s32.totalorder %s27_s26, 2  ;;  %p161_p1 = scmp.ne.s32.totalorder %s724_s20, %s720_s19 }
   0x7   : > { %p162_p2 = scmp.eq.s32.totalorder %s559_s24, 1  ;;  %p167_p3 = scmp.ne.s32.totalorder %s720_s19, %s716_s18 }
   0x8   : > { %s939_s26 = smov (%p28_p0, %s27_s26), 0  ;;  %p168_p5 = scmp.eq.s32.totalorder %s560_s25, 1 }
   0x9   : > { %p815_p4 = por %p162_p2, %p161_p1  ;;  %s147_s29 = ssub.s32 %s732_s22, %s939_s26 }
   0xa   : > { %p563_p6 = scmp.ge.s32.totalorder %s736_s23, 1  ;;  %p149_p7 = scmp.eq.s32.totalorder %s147_s29, 0 }
   0xb   : > { %p822_p8 = por %p168_p5, %p167_p3  ;;  %p209_p9 = scmp.lt.s32.totalorder %s736_s23, 3 }
   0xc   : > { %s828_s6 = scalar_select %p149_p7, %s724_s20, %s151_s27  }
   0xd   : > { %p210_p10 = pnand %p563_p6, %p209_p9 }
   0xe   : > { %p242_p11 = scmp.lt.s32.totalorder (!%p210_p10), %s728_s21, 1  ;;  %v738_v0 = vmov (!%p210_p10), 0.0   ;;  %vm739_vm0 = vmmov (!%p210_p10), 0   ;;  %v251_v1 = vld [vmem:[%s927_s2] sm:$0xff] (!%p210_p10)  ;;  %v740_v2 = vmov (!%p210_p10), 0   ;;  %vm257_vm1 = vcmask (!%p210_p10), 64512  }
   0xf   : > { %213 = sbr.rel (%p210_p10) target bundleno = 483 (0x1e3), region = 40  ;;  %582 = vmatprep.subr.mxu0 (!%p210_p10), %v738_v0  ;;  %584 = vmatprep.mubr.msk.f32.mxu0 (!%p210_p10), %vm739_vm0, %v738_v0  ;;  %v336_v3 = vld [vmem:[%s929_s4] sm:$0xff] (!%p210_p10)  ;;  %v339_v6 = vld [vmem:[%s929_s4 + $0x18] sm:$0xff] (!%p210_p10)  ;;  %v337_v8 = vld [vmem:[%s929_s4 + $0x8] sm:$0xff] (!%p210_p10)  ;;  %s237_s17 = sand.u32 (!%p210_p10), 1, %s720_s19  }
  0x10   : > { %656 = vset.pattern.permute.xlu0 (!%p210_p10), %v740_v2  ;;  %657 = vset.pattern.permute.xlu1 (!%p210_p10), %v740_v2  ;;  %v250_v4 = vld [vmem:[%s926_s1] sm:$0xff] (!%p210_p10)  ;;  %v338_v9 = vld [vmem:[%s929_s4 + $0x10] sm:$0xff] (!%p210_p10)  ;;  %v333_v15 = vld [vmem:[%s928_s3 + $0x8] sm:$0xff] (!%p210_p10)  ;;  %s564_s24 = sshll.u32 (!%p210_p10), %s237_s17, 5  ;;  %s572_s29 = sshll.u32 (!%p210_p10), %s728_s21, 7 }
  0x11   : > { %254 = vperm.xlu0 (!%p210_p10), %656, %v251_v1   ;;  %v332_v7 = vld [vmem:[%s928_s3] sm:$0xff] (!%p210_p10)  ;;  %347 = vperm.xlu1 (!%p210_p10), %657, %v337_v8   ;;  %v334_v16 = vld [vmem:[%s928_s3 + $0x10] sm:$0xff] (!%p210_p10)  ;;  %v335_v17 = vld [vmem:[%s928_s3 + $0x18] sm:$0xff] (!%p210_p10)  ;;  %s239_s25 = scalar_lea.vmem (!%p210_p10), [#allocation2], %s564_s24  ;;  %s741_s11 = smov (!%p210_p10), [#allocation2]  }
  0x12   : > { %589 = vmatprep.mubr.msk.f32.mxu1 (!%p210_p10), %vm257_vm1, %v332_v7  ;;  %s481_s27 = sshll.u32 (!%p210_p10), %s239_s25, 4  ;;  %s662_s12 = sshll.u32 (!%p210_p10), %s741_s11, 4  ;;  %s872_s27 = int_to_ptr.vmem [resolvable:$true] %s481_s27  ;;  %s663_s12 = int_to_ptr.vmem [resolvable:$false] %s662_s12 }
  0x13   : > { %s664_s13 = scalar_lea.vmem (!%p210_p10), %s663_s12, 1024  ;;  %p665_p1 = scmp.lt.s32.totalorder (!%p210_p10), %s872_s27, %s663_s12 }
  0x15   : > { %342 = vperm.xlu0 (!%p210_p10), %656, %v336_v3   ;;  %352 = vperm.xlu1 (!%p210_p10), %657, %v338_v9  }
  0x16   : > { %s243_s9 = scalar_select %p242_p11, %s728_s21, 1 }
  0x17   : > { %s879_s21 = scalar_lea.sflag [#allocation3], %s237_s17 }
  0x18   : > { %s565_s10 = sshll.u32 %s243_s9, 3  ;;  %s877_s9 = scalar_lea.hbm %s930_s5, %s572_s29 }
  0x19   : > { %s247_s15 = scalar_lea.vmem %s925_s0, %s565_s10  ;;  %357 = vperm.xlu0 %656, %v339_v6   ;;  %s658_s10 = scalar_lea.vmem %s872_s27, 512 }
  0x1a   : > { %v249_v5 = vld [vmem:[%s247_s15] sm:$0xff]  ;;  %p659_p12 = scmp.ne.s32.totalorder %s872_s27, %s658_s10  ;;  %p666_p2 = scmp.lt.s32.totalorder %s664_s13, %s658_s10 }
  0x1b   : > { %583 = vmatpush3.msra.mxu0 %v249_v5 }
  0x1c   : > { %585 = vmatmul.mubr.msk.f32.vlgmr.msra.gmra.mrb[0].mxu0 %vm257_vm1, %v250_v4  ;;  %p660_p13 = pnand %p659_p12, %p815_p4  ;;  %p667_p3 = por %p666_p2, %p665_p1 }
  0x1e   : > { %p661_p0 = pneg %p660_p13 }
  0x20   : > { %p668_p5 = pnand %p667_p3, %p661_p0 }
  0x90   : > { %v255_v10 = vpop.permute.xlu0 %254  ;;  %v348_v19 = vpop.permute.xlu1 %347 }
  0x94   : > { %v343_v18 = vpop.permute.xlu0 %342  ;;  %v353_v28 = vpop.permute.xlu1 %352 }
  0x98   : > { %v358_v25 = vpop.permute.xlu0 %357 }
  0xef   : > { %v327_v11 = vpop.f32.mrb[0].mxu0 }
  0xf0   : > { %v328_v12 = vadd.f32 %v327_v11, %v255_v10  ;;  %v586_v13 = vpop.f32.mrb[1].mxu0 }
  0xf2   : > { %v331_v14 = vmax.f32 %v328_v12, 0.0 }
  0xf4   : > { %587 = vmatprep.subr.mxu1 %v331_v14 }
  0xf5   : > { %588 = vmatpush3.msra.mxu1 %v331_v14 }
  0xf6   : > { %590 = vmatmul.mubr.msk.f32.vlgmr.msra.gmra.mrb[0].mxu1 %vm257_vm1, %v333_v15 }
  0xf7   : > { %592 = vmatprep.mubr.msk.f32.mxu1 %vm257_vm1, %v334_v16 }
  0xfa   : > { %593 = vmatmul.mubr.msk.f32.gmra.mrb[2].mxu1 %vm257_vm1, %v335_v17 }
 0x1c9   : > { %v591_v20 = vpop.f32.mrb[0].mxu1 }
 0x1ca   : > { %v444_v21 = vadd.f32 %v591_v20, %v348_v19  ;;  %v438_v22 = vpop.f32.mrb[1].mxu1 }
 0x1cb   : > { %v439_v23 = vadd.f32 %v438_v22, %v343_v18 }
 0x1cc   : > { %v458_v24 = vmax.f32 %v444_v21, 0.0 }
 0x1cd   : > { %v457_v26 = vmax.f32 %v439_v23, 0.0  ;;  %v594_v27 = vpop.f32.mrb[2].mxu1 }
 0x1ce   : > { %462 = vst [vmem:[%s239_s25 + $0x8] sm:$0xff] %v458_v24  ;;  %v454_v29 = vadd.f32 %v594_v27, %v358_v25  ;;  %v448_v30 = vpop.f32.mrb[3].mxu1 }
 0x1cf   : > { %461 = vst [vmem:[%s239_s25] sm:$0xff] %v457_v26  ;;  %v449_v31 = vadd.f32 %v448_v30, %v353_v28 }
 0x1d0   : > { %v460_v32 = vmax.f32 %v454_v29, 0.0 }
 0x1d1   : > { %v459_v33 = vmax.f32 %v449_v31, 0.0 }
 0x1d2   : > { %464 = vst [vmem:[%s239_s25 + $0x18] sm:$0xff] %v460_v32 }
 0x1d3   : > { %463 = vst [vmem:[%s239_s25 + $0x10] sm:$0xff] %v459_v33 }
 0x1d4   : > { %671 = shalt.err (!%p668_p5)
}
 0x1d5   : > { %s672_s14 = scalar_lea.hbm %s877_s9, 512  ;;  %s676_s17 = scalar_lea.hbm %s930_s5, 1024 }
 0x1d6   : > { %p673_p6 = scmp.ne.s32.totalorder %s877_s9, %s672_s14  ;;  %p677_p10 = scmp.lt.u32.totalorder %s877_s9, %s930_s5 }
 0x1d7   : > { %p678_p11 = scmp.lt.u32.totalorder %s676_s17, %s672_s14  ;;  %p680_p13 = scmp.lt.u32.totalorder %s672_s14, %s877_s9 }
 0x1d8   : > { %p674_p7 = pnand %p673_p6, %p815_p4 }
 0x1d9   : > { %p679_p12 = por %p678_p11, %p677_p10 }
 0x1da   : > { %p675_p9 = pneg %p674_p7 }
 0x1db   : > { %p681_p0 = por %p680_p13, %p679_p12 }
 0x1dd   : > { %p682_p1 = pnand %p681_p0, %p675_p9 }
 0x1df   : > { %685 = shalt.err (!%p682_p1)
}
 0x1e0   : > { %s742_s29 = smov 128   ;;  %s743_s7 = smov 256  }
 0x1e1   : > { %s744_s8 = smov 8  }
 0x1e2   : > { %595 = dma.vmem_to_hbm [thread:$0]  (%p815_p4), %s872_s27, 512, %s877_s9, %s879_s21, %s742_s29, %s743_s7, %s744_s8  }
 0x1e3 PF: > { %p601_p2 = scmp.ge.s32.totalorder %s736_s23, 2  ;;  %s496_s10 = sand.u32 1, %s716_s18  }
 0x1e4   : > { %s497_s11 = scalar_lea.sflag [#allocation3], %s496_s10 }
 0x1e5   : > { %p598_p3 = pnand %p601_p2, %p822_p8 }
 0x1e7   : > { %711 = dma.done.wait (!%p598_p3), %s497_s11, 512  }
 0x1e8   : > { %713 = vsyncadd (!%p598_p3), %s497_s11, 4294966784  ;;  %s18_s23 = sadd.s32 1, %s736_s23   ;;  %s933_s18 = smov %s720_s19 }
 0x1e9   : > { %p15_p5 = scmp.ge.s32.totalorder %s18_s23, 4   ;;  %s934_s19 = smov %s724_s20 }
 0x1ea   : > { %s935_s20 = smov %s828_s6  ;;  %s936_s21 = smov %s732_s22 }
 0x1eb   : > { %s937_s22 = smov %s939_s26  ;;  %17 = sbr.rel (!%p15_p5) target bundleno = 4 (0x4), region = 75 }
 0x1f2   :  { %502 = vsyncpa [#allocation3], 1 }
 0x1f3   :  { %504 = vsyncpa [#allocation3 + $0x1], 1 }

</bundles_post_ra>
